<compile_context>
chip_gen: v7x
topology: tpu7x:2x2x1
jax: 0.10.0
libtpu: 0.0.40
codegen_flags: <defaults>
</compile_context>

<pallas_src>
import functools
import math

import jax
import jax.numpy as jnp
from jax.experimental import pallas as pl
from jax.experimental.pallas import tpu as pltpu

BN_EPS = 1e-5


# ---------------------------------------------------------------------------
# Fused kernel: (BN-folded) QKV projection + multi-head self-attention +
# output projection for one batch element (grid over B). VMEM-resident.
# ---------------------------------------------------------------------------
def fused_bn_attn_kernel(x_ref, wqkv_ref, bqkv_ref, wo_ref, bo_ref, o_ref, *,
                         num_heads):
    C = wo_ref.shape[0]
    dh = C // num_heads

    xb = x_ref[...]                                       # (C, L), this batch

    # fused BN + Q/K/V projection: BN scale/shift already folded into wqkv/bqkv
    qkvT = jnp.dot(wqkv_ref[...], xb,
                   preferred_element_type=jnp.float32) + bqkv_ref[...]   # (3C, L)

    # --- per-head attention; head slices are 8-row sublane slices -----------
    heads = []
    for h in range(num_heads):                            # static unroll
        r0 = h * dh
        qhT = qkvT[r0:r0 + dh, :]                         # (dh, L), pre-scaled
        khT = qkvT[C + r0:C + r0 + dh, :]                 # (dh, L)
        vhT = qkvT[2 * C + r0:2 * C + r0 + dh, :]         # (dh, L)

        # transposed scores: sT[j, i] = k_j . q_i  (contract dh axis of both)
        # -> P·V below needs no XLU transpose of the 64x64 probability tile.
        sT = jax.lax.dot_general(khT, qhT, (((0,), (0,)), ((), ())),
                                 preferred_element_type=jnp.float32)     # (L, L)

        # softmax over the key axis (axis 0): max-subtract, exp (EUP),
        # approximate reciprocal (EUP) * mul
        m = jnp.max(sT, axis=0, keepdims=True)            # (1, L)
        e = jnp.exp(sT - m)
        r = pl.reciprocal(jnp.sum(e, axis=0, keepdims=True), approx=True)
        pT = e * r                                         # (L, L), cols sum to 1

        # oh^T[d, i] = sum_j v^T[d, j] * pT[j, i]  -- natural MXU orientation
        heads.append(jnp.dot(vhT, pT,
                             preferred_element_type=jnp.float32))        # (dh, L)

    # stack heads along sublanes (dh % 8 == 0 -> aligned, stays in registers)
    headsT = jnp.concatenate(heads, axis=0)                # (C, L)

    # --- output projection, produced directly in (C, L) layout --------------
    out = jnp.dot(wo_ref[...], headsT,
                  preferred_element_type=jnp.float32) + bo_ref[...]      # (C, L)
    o_ref[...] = out.astype(o_ref.dtype)


# ---------------------------------------------------------------------------
# Wrapper
# ---------------------------------------------------------------------------
def self_attention_block(x_nchw, params, num_heads):
    B, C, H, W = x_nchw.shape
    L = H * W
    assert C % num_heads == 0, "embed_dim must be divisible by num_heads"
    dh = C // num_heads
    assert dh % 8 == 0, "head_dim must be a multiple of 8 (f32 sublane tile)"
    # scaling guard: this kernel materializes full (L, L) f32 score tiles;
    # switch to flash-style K/V tiling (online softmax) before L grows against
    # the 64 MiB (v7x) / 32 MiB scoped (v6e) VMEM budgets.
    assert L <= 1024, "L = H*W too large for non-flash kernel; tile over K/V"

    attn_scale = 1.0 / math.sqrt(dh)
    x = x_nchw.reshape(B, C, L).astype(jnp.float32)

    # BatchNorm1d, training-mode (biased) batch statistics over (B, L) --------
    # hoisted out of the kernel: one tiny reduction here, then folded into the
    # fused QKV projection:  Wqkv@(x*s + t) + b == (Wqkv*s)@x + (Wqkv@t + b)
    mean = jnp.mean(x, axis=(0, 2))                                     # (C,)
    var = jnp.mean((x - mean[None, :, None]) ** 2, axis=(0, 2))         # (C,)
    inv = jax.lax.rsqrt(var + BN_EPS)
    bn_scale = params["bn_gamma"].astype(jnp.float32) * inv             # (C,)
    bn_shift = params["bn_beta"].astype(jnp.float32) - mean * bn_scale  # (C,)

    # fuse Q/K/V weights into one (3C, C) matrix; fold 1/sqrt(dh) into Wq/bq
    wqkv = jnp.concatenate(
        [params["wq"] * attn_scale, params["wk"], params["wv"]], axis=0
    ).astype(jnp.float32)                                                # (3C, C)
    bqkv = jnp.concatenate(
        [params["bq"] * attn_scale, params["bk"], params["bv"]], axis=0
    ).astype(jnp.float32)                                                # (3C,)
    wqkv_f = wqkv * bn_scale[None, :]                                    # (3C, C)
    bqkv_f = (wqkv @ bn_shift + bqkv).reshape(3 * C, 1)                  # (3C, 1)
    wo = params["wo"].astype(jnp.float32)                                # (C, C)
    bo = params["bo"].reshape(C, 1).astype(jnp.float32)                  # (C, 1)

    kern = functools.partial(fused_bn_attn_kernel, num_heads=num_heads)
    full2d = lambda b: (0, 0)

    y = pl.pallas_call(
        kern,
        out_shape=jax.ShapeDtypeStruct((B, C, L), jnp.float32),
        grid=(B,),
        in_specs=[
            # per-batch x block: footprint independent of B, double-buffered
            pl.BlockSpec((None, C, L), lambda b: (b, 0, 0)),
            pl.BlockSpec((3 * C, C), full2d),      # fused Wqkv (BN+scale folded)
            pl.BlockSpec((3 * C, 1), full2d),      # fused bqkv (BN+scale folded)
            pl.BlockSpec((C, C), full2d),          # Wo
            pl.BlockSpec((C, 1), full2d),          # bo
        ],
        # output written directly in (B, C, L) layout, batch dim squeezed
        out_specs=pl.BlockSpec((None, C, L), lambda b: (b, 0, 0)),
        compiler_params=pltpu.CompilerParams(dimension_semantics=("parallel",)),
    )(x, wqkv_f, bqkv_f, wo, bo)

    # (B, C, L) -> (B, C, H, W): layout-preserving reshape, no transpose pass
    return y.reshape(B, C, H, W)


# ---------------------------------------------------------------------------
# Pure-JAX reference (same math as the PyTorch module) for a sanity check
# ---------------------------------------------------------------------------
def reference(x_nchw, params, num_heads):
    B, C, H, W = x_nchw.shape
    L = H * W
    x = x_nchw.reshape(B, C, L).astype(jnp.float32)
    mean = x.mean(axis=(0, 2), keepdims=True)
    var = ((x - mean) ** 2).mean(axis=(0, 2), keepdims=True)
    xn = (x - mean) / jnp.sqrt(var + BN_EPS)
    xn = xn * params["bn_gamma"][None, :, None] + params["bn_beta"][None, :, None]
    xt = jnp.transpose(xn, (0, 2, 1))                     # (B, L, C)

    dh = C // num_heads
    q = xt @ params["wq"].T + params["bq"]
    k = xt @ params["wk"].T + params["bk"]
    v = xt @ params["wv"].T + params["bv"]
    qh = q.reshape(B, L, num_heads, dh).transpose(0, 2, 1, 3)
    kh = k.reshape(B, L, num_heads, dh).transpose(0, 2, 1, 3)
    vh = v.reshape(B, L, num_heads, dh).transpose(0, 2, 1, 3)
    s = jnp.einsum("bhqd,bhkd->bhqk", qh, kh) / math.sqrt(dh)
    p = jax.nn.softmax(s, axis=-1)
    o = jnp.einsum("bhqk,bhkd->bhqd", p, vh)
    o = o.transpose(0, 2, 1, 3).reshape(B, L, C)
    o = o @ params["wo"].T + params["bo"]
    return jnp.transpose(o, (0, 2, 1)).reshape(B, C, H, W)


if __name__ == "__main__":
    B, C, H, W = 2, 32, 8, 8
    num_heads = 4

    key = jax.random.PRNGKey(0)
    k_x, k_in, k_ib, k_ow, k_ob = jax.random.split(key, 5)

    x = jax.random.normal(k_x, (B, C, H, W), dtype=jnp.float32)

    # deterministic synthetic parameters (shapes follow nn.MultiheadAttention /
    # nn.BatchNorm1d __init__); not a checkpoint load.
    in_proj_w = jax.random.normal(k_in, (3 * C, C), dtype=jnp.float32) / math.sqrt(C)
    in_proj_b = 0.1 * jax.random.normal(k_ib, (3 * C,), dtype=jnp.float32)
    out_proj_w = jax.random.normal(k_ow, (C, C), dtype=jnp.float32) / math.sqrt(C)
    out_proj_b = 0.1 * jax.random.normal(k_ob, (C,), dtype=jnp.float32)

    params = {
        "bn_gamma": jnp.ones((C,), jnp.float32),
        "bn_beta": jnp.zeros((C,), jnp.float32),
        "wq": in_proj_w[0:C], "wk": in_proj_w[C:2 * C], "wv": in_proj_w[2 * C:3 * C],
        "bq": in_proj_b[0:C], "bk": in_proj_b[C:2 * C], "bv": in_proj_b[2 * C:3 * C],
        "wo": out_proj_w, "bo": out_proj_b,
    }

    fn = jax.jit(functools.partial(self_attention_block, num_heads=num_heads))
    out = jax.block_until_ready(fn(x, params))

    ref = jax.block_until_ready(reference(x, params, num_heads))
    assert out.shape == (B, C, H, W)
    # tolerance leaves headroom for the EUP approximate reciprocal in softmax
    # and the host-side BN-into-weights fold (reassociation-level rounding only)
    assert jnp.allclose(out, ref, atol=2e-3, rtol=2e-3), "mismatch vs reference"

    print("KERNEL_OK")
</pallas_src>

<mosaic_0001>
module attributes {stable_mosaic.version = 11 : i64} {
  func.func @fused_bn_attn_kernel(%arg0: i32, %arg1: memref<1x32x64xf32, #tpu.memory_space<vmem>>, %arg2: memref<96x32xf32, #tpu.memory_space<vmem>>, %arg3: memref<96x1xf32, #tpu.memory_space<vmem>>, %arg4: memref<32x32xf32, #tpu.memory_space<vmem>>, %arg5: memref<32x1xf32, #tpu.memory_space<vmem>>, %arg6: memref<1x32x64xf32, #tpu.memory_space<vmem>>) attributes {dimension_semantics = [#tpu.dimension_semantics<parallel>], iteration_bounds = array<i64: 2>, scalar_prefetch = 0 : i64, scratch_operands = 0 : i64, tpu.core_type = #tpu.core_type<tc>, window_params = [{transform_indices = @transform_0, window_bounds = array<i64: 1, 32, 64>}, {pipeline_mode = #tpu.pipeline_mode<synchronous>, transform_indices = @transform_1, window_bounds = array<i64: 96, 32>}, {pipeline_mode = #tpu.pipeline_mode<synchronous>, transform_indices = @transform_2, window_bounds = array<i64: 96, 1>}, {pipeline_mode = #tpu.pipeline_mode<synchronous>, transform_indices = @transform_3, window_bounds = array<i64: 32, 32>}, {pipeline_mode = #tpu.pipeline_mode<synchronous>, transform_indices = @transform_4, window_bounds = array<i64: 32, 1>}, {transform_indices = @transform_5, window_bounds = array<i64: 1, 32, 64>}]} {
    %c0 = arith.constant 0 : index
    %c0_0 = arith.constant 0 : index
    %c0_1 = arith.constant 0 : index
    %0 = vector.load %arg1[%c0, %c0_0, %c0_1] : memref<1x32x64xf32, #tpu.memory_space<vmem>>, vector<1x32x64xf32>
    %1 = vector.shape_cast %0 : vector<1x32x64xf32> to vector<32x64xf32>
    %c0_2 = arith.constant 0 : index
    %c0_3 = arith.constant 0 : index
    %2 = vector.load %arg2[%c0_2, %c0_3] : memref<96x32xf32, #tpu.memory_space<vmem>>, vector<96x32xf32>
    %cst = arith.constant dense<0.000000e+00> : vector<96x64xf32>
    %3 = tpu.matmul %2, %1, %cst {dimension_numbers = #tpu.dot_dimension_numbers<[1], [0], [0], [1], [0, 0, 1, 1], [], []>} : vector<96x32xf32>, vector<32x64xf32>, vector<96x64xf32> -> vector<96x64xf32>
    %c0_4 = arith.constant 0 : index
    %c0_5 = arith.constant 0 : index
    %4 = vector.load %arg3[%c0_4, %c0_5] : memref<96x1xf32, #tpu.memory_space<vmem>>, vector<96x1xf32>
    %5 = vector.broadcast %4 : vector<96x1xf32> to vector<96x64xf32>
    %6 = arith.addf %3, %5 : vector<96x64xf32>
    %7 = vector.extract_strided_slice %6 {offsets = [0, 0], sizes = [8, 64], strides = [1, 1]} : vector<96x64xf32> to vector<8x64xf32>
    %8 = vector.extract_strided_slice %6 {offsets = [32, 0], sizes = [8, 64], strides = [1, 1]} : vector<96x64xf32> to vector<8x64xf32>
    %9 = vector.extract_strided_slice %6 {offsets = [64, 0], sizes = [8, 64], strides = [1, 1]} : vector<96x64xf32> to vector<8x64xf32>
    %cst_6 = arith.constant dense<0.000000e+00> : vector<64x64xf32>
    %10 = tpu.matmul %8, %7, %cst_6 {dimension_numbers = #tpu.dot_dimension_numbers<[0], [0], [1], [1], [0, 1, 1, 1], [], []>} : vector<8x64xf32>, vector<8x64xf32>, vector<64x64xf32> -> vector<64x64xf32>
    %cst_7 = arith.constant dense<0xFF800000> : vector<64xf32>
    %11 = vector.multi_reduction <maximumf>, %10, %cst_7 [0] : vector<64x64xf32> to vector<64xf32>
    %12 = vector.shape_cast %11 : vector<64xf32> to vector<1x64xf32>
    %13 = vector.broadcast %12 : vector<1x64xf32> to vector<64x64xf32>
    %14 = arith.subf %10, %13 : vector<64x64xf32>
    %15 = math.exp %14 : vector<64x64xf32>
    %cst_8 = arith.constant dense<0.000000e+00> : vector<64xf32>
    %16 = vector.multi_reduction <add>, %15, %cst_8 [0] : vector<64x64xf32> to vector<64xf32>
    %17 = vector.shape_cast %16 : vector<64xf32> to vector<1x64xf32>
    %18 = tpu.reciprocal %17 {approx = true} : vector<1x64xf32> -> vector<1x64xf32>
    %19 = vector.broadcast %18 : vector<1x64xf32> to vector<64x64xf32>
    %20 = arith.mulf %15, %19 : vector<64x64xf32>
    %cst_9 = arith.constant dense<0.000000e+00> : vector<8x64xf32>
    %21 = tpu.matmul %9, %20, %cst_9 {dimension_numbers = #tpu.dot_dimension_numbers<[1], [0], [0], [1], [0, 0, 1, 1], [], []>} : vector<8x64xf32>, vector<64x64xf32>, vector<8x64xf32> -> vector<8x64xf32>
    %22 = vector.extract_strided_slice %6 {offsets = [8, 0], sizes = [8, 64], strides = [1, 1]} : vector<96x64xf32> to vector<8x64xf32>
    %23 = vector.extract_strided_slice %6 {offsets = [40, 0], sizes = [8, 64], strides = [1, 1]} : vector<96x64xf32> to vector<8x64xf32>
    %24 = vector.extract_strided_slice %6 {offsets = [72, 0], sizes = [8, 64], strides = [1, 1]} : vector<96x64xf32> to vector<8x64xf32>
    %cst_10 = arith.constant dense<0.000000e+00> : vector<64x64xf32>
    %25 = tpu.matmul %23, %22, %cst_10 {dimension_numbers = #tpu.dot_dimension_numbers<[0], [0], [1], [1], [0, 1, 1, 1], [], []>} : vector<8x64xf32>, vector<8x64xf32>, vector<64x64xf32> -> vector<64x64xf32>
    %cst_11 = arith.constant dense<0xFF800000> : vector<64xf32>
    %26 = vector.multi_reduction <maximumf>, %25, %cst_11 [0] : vector<64x64xf32> to vector<64xf32>
    %27 = vector.shape_cast %26 : vector<64xf32> to vector<1x64xf32>
    %28 = vector.broadcast %27 : vector<1x64xf32> to vector<64x64xf32>
    %29 = arith.subf %25, %28 : vector<64x64xf32>
    %30 = math.exp %29 : vector<64x64xf32>
    %cst_12 = arith.constant dense<0.000000e+00> : vector<64xf32>
    %31 = vector.multi_reduction <add>, %30, %cst_12 [0] : vector<64x64xf32> to vector<64xf32>
    %32 = vector.shape_cast %31 : vector<64xf32> to vector<1x64xf32>
    %33 = tpu.reciprocal %32 {approx = true} : vector<1x64xf32> -> vector<1x64xf32>
    %34 = vector.broadcast %33 : vector<1x64xf32> to vector<64x64xf32>
    %35 = arith.mulf %30, %34 : vector<64x64xf32>
    %cst_13 = arith.constant dense<0.000000e+00> : vector<8x64xf32>
    %36 = tpu.matmul %24, %35, %cst_13 {dimension_numbers = #tpu.dot_dimension_numbers<[1], [0], [0], [1], [0, 0, 1, 1], [], []>} : vector<8x64xf32>, vector<64x64xf32>, vector<8x64xf32> -> vector<8x64xf32>
    %37 = vector.extract_strided_slice %6 {offsets = [16, 0], sizes = [8, 64], strides = [1, 1]} : vector<96x64xf32> to vector<8x64xf32>
    %38 = vector.extract_strided_slice %6 {offsets = [48, 0], sizes = [8, 64], strides = [1, 1]} : vector<96x64xf32> to vector<8x64xf32>
    %39 = vector.extract_strided_slice %6 {offsets = [80, 0], sizes = [8, 64], strides = [1, 1]} : vector<96x64xf32> to vector<8x64xf32>
    %cst_14 = arith.constant dense<0.000000e+00> : vector<64x64xf32>
    %40 = tpu.matmul %38, %37, %cst_14 {dimension_numbers = #tpu.dot_dimension_numbers<[0], [0], [1], [1], [0, 1, 1, 1], [], []>} : vector<8x64xf32>, vector<8x64xf32>, vector<64x64xf32> -> vector<64x64xf32>
    %cst_15 = arith.constant dense<0xFF800000> : vector<64xf32>
    %41 = vector.multi_reduction <maximumf>, %40, %cst_15 [0] : vector<64x64xf32> to vector<64xf32>
    %42 = vector.shape_cast %41 : vector<64xf32> to vector<1x64xf32>
    %43 = vector.broadcast %42 : vector<1x64xf32> to vector<64x64xf32>
    %44 = arith.subf %40, %43 : vector<64x64xf32>
    %45 = math.exp %44 : vector<64x64xf32>
    %cst_16 = arith.constant dense<0.000000e+00> : vector<64xf32>
    %46 = vector.multi_reduction <add>, %45, %cst_16 [0] : vector<64x64xf32> to vector<64xf32>
    %47 = vector.shape_cast %46 : vector<64xf32> to vector<1x64xf32>
    %48 = tpu.reciprocal %47 {approx = true} : vector<1x64xf32> -> vector<1x64xf32>
    %49 = vector.broadcast %48 : vector<1x64xf32> to vector<64x64xf32>
    %50 = arith.mulf %45, %49 : vector<64x64xf32>
    %cst_17 = arith.constant dense<0.000000e+00> : vector<8x64xf32>
    %51 = tpu.matmul %39, %50, %cst_17 {dimension_numbers = #tpu.dot_dimension_numbers<[1], [0], [0], [1], [0, 0, 1, 1], [], []>} : vector<8x64xf32>, vector<64x64xf32>, vector<8x64xf32> -> vector<8x64xf32>
    %52 = vector.extract_strided_slice %6 {offsets = [24, 0], sizes = [8, 64], strides = [1, 1]} : vector<96x64xf32> to vector<8x64xf32>
    %53 = vector.extract_strided_slice %6 {offsets = [56, 0], sizes = [8, 64], strides = [1, 1]} : vector<96x64xf32> to vector<8x64xf32>
    %54 = vector.extract_strided_slice %6 {offsets = [88, 0], sizes = [8, 64], strides = [1, 1]} : vector<96x64xf32> to vector<8x64xf32>
    %cst_18 = arith.constant dense<0.000000e+00> : vector<64x64xf32>
    %55 = tpu.matmul %53, %52, %cst_18 {dimension_numbers = #tpu.dot_dimension_numbers<[0], [0], [1], [1], [0, 1, 1, 1], [], []>} : vector<8x64xf32>, vector<8x64xf32>, vector<64x64xf32> -> vector<64x64xf32>
    %cst_19 = arith.constant dense<0xFF800000> : vector<64xf32>
    %56 = vector.multi_reduction <maximumf>, %55, %cst_19 [0] : vector<64x64xf32> to vector<64xf32>
    %57 = vector.shape_cast %56 : vector<64xf32> to vector<1x64xf32>
    %58 = vector.broadcast %57 : vector<1x64xf32> to vector<64x64xf32>
    %59 = arith.subf %55, %58 : vector<64x64xf32>
    %60 = math.exp %59 : vector<64x64xf32>
    %cst_20 = arith.constant dense<0.000000e+00> : vector<64xf32>
    %61 = vector.multi_reduction <add>, %60, %cst_20 [0] : vector<64x64xf32> to vector<64xf32>
    %62 = vector.shape_cast %61 : vector<64xf32> to vector<1x64xf32>
    %63 = tpu.reciprocal %62 {approx = true} : vector<1x64xf32> -> vector<1x64xf32>
    %64 = vector.broadcast %63 : vector<1x64xf32> to vector<64x64xf32>
    %65 = arith.mulf %60, %64 : vector<64x64xf32>
    %cst_21 = arith.constant dense<0.000000e+00> : vector<8x64xf32>
    %66 = tpu.matmul %54, %65, %cst_21 {dimension_numbers = #tpu.dot_dimension_numbers<[1], [0], [0], [1], [0, 0, 1, 1], [], []>} : vector<8x64xf32>, vector<64x64xf32>, vector<8x64xf32> -> vector<8x64xf32>
    %67 = tpu.concatenate %21, %36, %51, %66 in 0 : vector<8x64xf32>, vector<8x64xf32>, vector<8x64xf32>, vector<8x64xf32> -> vector<32x64xf32>
    %c0_22 = arith.constant 0 : index
    %c0_23 = arith.constant 0 : index
    %68 = vector.load %arg4[%c0_22, %c0_23] : memref<32x32xf32, #tpu.memory_space<vmem>>, vector<32x32xf32>
    %cst_24 = arith.constant dense<0.000000e+00> : vector<32x64xf32>
    %69 = tpu.matmul %68, %67, %cst_24 {dimension_numbers = #tpu.dot_dimension_numbers<[1], [0], [0], [1], [0, 0, 1, 1], [], []>} : vector<32x32xf32>, vector<32x64xf32>, vector<32x64xf32> -> vector<32x64xf32>
    %c0_25 = arith.constant 0 : index
    %c0_26 = arith.constant 0 : index
    %70 = vector.load %arg5[%c0_25, %c0_26] : memref<32x1xf32, #tpu.memory_space<vmem>>, vector<32x1xf32>
    %71 = vector.broadcast %70 : vector<32x1xf32> to vector<32x64xf32>
    %72 = arith.addf %69, %71 : vector<32x64xf32>
    %c0_27 = arith.constant 0 : index
    %c0_28 = arith.constant 0 : index
    %c0_29 = arith.constant 0 : index
    %73 = vector.load %arg6[%c0_27, %c0_28, %c0_29] : memref<1x32x64xf32, #tpu.memory_space<vmem>>, vector<1x32x64xf32>
    %74 = vector.shape_cast %73 : vector<1x32x64xf32> to vector<32x64xf32>
    %75 = vector.shape_cast %72 : vector<32x64xf32> to vector<1x32x64xf32>
    tpu.vector_store %arg6[%c0_27, %c0_28, %c0_29], %75 {strides = array<i32>} : memref<1x32x64xf32, #tpu.memory_space<vmem>>, vector<1x32x64xf32>,
    return
  }
  func.func @transform_0(%arg0: i32) -> (i32, i32, i32) {
    %c0_i32 = arith.constant 0 : i32
    %c0_i32_0 = arith.constant 0 : i32
    %c0_i32_1 = arith.constant 0 : i32
    return %arg0, %c0_i32, %c0_i32_0 : i32, i32, i32
  }
  func.func @transform_1(%arg0: i32) -> (i32, i32) {
    %c0_i32 = arith.constant 0 : i32
    %c0_i32_0 = arith.constant 0 : i32
    %c0_i32_1 = arith.constant 0 : i32
    return %c0_i32, %c0_i32_0 : i32, i32
  }
  func.func @transform_2(%arg0: i32) -> (i32, i32) {
    %c0_i32 = arith.constant 0 : i32
    %c0_i32_0 = arith.constant 0 : i32
    %c0_i32_1 = arith.constant 0 : i32
    return %c0_i32, %c0_i32_0 : i32, i32
  }
  func.func @transform_3(%arg0: i32) -> (i32, i32) {
    %c0_i32 = arith.constant 0 : i32
    %c0_i32_0 = arith.constant 0 : i32
    %c0_i32_1 = arith.constant 0 : i32
    return %c0_i32, %c0_i32_0 : i32, i32
  }
  func.func @transform_4(%arg0: i32) -> (i32, i32) {
    %c0_i32 = arith.constant 0 : i32
    %c0_i32_0 = arith.constant 0 : i32
    %c0_i32_1 = arith.constant 0 : i32
    return %c0_i32, %c0_i32_0 : i32, i32
  }
  func.func @transform_5(%arg0: i32) -> (i32, i32, i32) {
    %c0_i32 = arith.constant 0 : i32
    %c0_i32_0 = arith.constant 0 : i32
    %c0_i32_1 = arith.constant 0 : i32
    return %arg0, %c0_i32, %c0_i32_0 : i32, i32, i32
  }
}

</mosaic_0001>

<bundles_post_ra>
// kernel: self_attention_block.1
= control target key start
LH: loop header
LB: loop body
LE: loop exit
PB: predicated region body
PF: predicated region fallthrough
CT: control target
= control target key end

     0   :  { %s2426_s18 = smov 0   ;;  %s2786_s0 = inlined_call_operand.vmem [shape: f32[2,32,64], index: 0, kind: input, shape index: {}]   ;;  %s2787_s1 = inlined_call_operand.vmem [shape: f32[96,32], index: 1, kind: input, shape index: {}]   ;;  %s2788_s2 = inlined_call_operand.vmem [shape: f32[96,1], index: 2, kind: input, shape index: {}]   ;;  %s2789_s3 = inlined_call_operand.vmem [shape: f32[32,32], index: 3, kind: input, shape index: {}]   ;;  %s2790_s4 = inlined_call_operand.vmem [shape: f32[32,1], index: 4, kind: input, shape index: {}]   ;;  %s2791_s5 = inlined_call_operand.vmem [shape: f32[2,32,64], index: 5, kind: output, shape index: {}]  }
   0x1 LB: > { %s1897_s19 = sadd.s32 4294967295, %s2390_s18   ;;  %p1901_p0 = scmp.ge.s32.totalorder %s2390_s18, 1  ;;  %s2390_s18 = sphi %s2426_s18, %s15_s18  }
   0x2   : > { %p187_p1 = scmp.lt.s32.totalorder %s2390_s18, 3 }
   0x4   : > { %p188_p2 = pnand %p1901_p0, %p187_p1 }
   0x5   : > { %p215_p3 = scmp.lt.s32.totalorder (!%p188_p2), %s1897_s19, 1  ;;  %v229_v0 = vld [vmem:[%s2787_s1] sm:$0xff] (!%p188_p2)  ;;  %vm313_vm0 = vcmask (!%p188_p2), 261120   ;;  %v2392_v1 = vmov (!%p188_p2), 0   ;;  %v242_v11 = vld [vmem:[%s2788_s2 + $0x8] sm:$0xff] (!%p188_p2)  ;;  %v231_v13 = vld [vmem:[%s2787_s1 + $0x10] sm:$0xff] (!%p188_p2) }
   0x6   : > { %191 = sbr.rel (%p188_p2) target bundleno = 2109 (0x83d), region = 40  ;;  %2066 = vmatprep.mubr.msk.f32.mxu0 (!%p188_p2), %vm313_vm0, %v229_v0  ;;  %2310 = vset.pattern.permute.xlu0 (!%p188_p2), %v2392_v1  ;;  %v245_v2 = vld [vmem:[%s2788_s2 + $0x20] sm:$0xff] (!%p188_p2)  ;;  %v230_v12 = vld [vmem:[%s2787_s1 + $0x8] sm:$0xff] (!%p188_p2)  ;;  %v232_v14 = vld [vmem:[%s2787_s1 + $0x18] sm:$0xff] (!%p188_p2)  ;;  %vm507_vm1 = vcmask (!%p188_p2), 64512   ;;  %v2393_v57 = vmov (!%p188_p2), 0.0|0.0  }
   0x7   : > { %275 = vperm.xlu0 (!%p188_p2), %2310, %v245_v2   ;;  %v241_v3 = vld [vmem:[%s2788_s2] sm:$0xff] (!%p188_p2)  ;;  %v234_v16 = vld [vmem:[%s2787_s1 + $0x28] sm:$0xff] (!%p188_p2)  ;;  %v235_v17 = vld [vmem:[%s2787_s1 + $0x30] sm:$0xff] (!%p188_p2)  ;;  %vm2394_vm2 = vmmov (!%p188_p2), 0   ;;  %v2395_v60 = vmov (!%p188_p2), 0.0   ;;  %vm637_vm3 = vcmask (!%p188_p2), 523264  }
   0x8   : > { %v249_v10 = vld [vmem:[%s2788_s2 + $0x40] sm:$0xff] (!%p188_p2)  ;;  %v236_v18 = vld [vmem:[%s2787_s1 + $0x38] sm:$0xff] (!%p188_p2)  ;;  %v238_v20 = vld [vmem:[%s2787_s1 + $0x48] sm:$0xff] (!%p188_p2) }
   0x9   : > { %v233_v15 = vld [vmem:[%s2787_s1 + $0x20] sm:$0xff] (!%p188_p2)  ;;  %v239_v35 = vld [vmem:[%s2787_s1 + $0x50] sm:$0xff] (!%p188_p2)  ;;  %v240_v36 = vld [vmem:[%s2787_s1 + $0x58] sm:$0xff] (!%p188_p2) }
   0xa   : > { %v237_v19 = vld [vmem:[%s2787_s1 + $0x40] sm:$0xff] (!%p188_p2)  ;;  %v246_v37 = vld [vmem:[%s2788_s2 + $0x28] sm:$0xff] (!%p188_p2)  ;;  %v243_v39 = vld [vmem:[%s2788_s2 + $0x10] sm:$0xff] (!%p188_p2) }
   0xb   : > { %255 = vperm.xlu0 (!%p188_p2), %2310, %v241_v3   ;;  %v250_v38 = vld [vmem:[%s2788_s2 + $0x48] sm:$0xff] (!%p188_p2)  ;;  %v247_v52 = vld [vmem:[%s2788_s2 + $0x30] sm:$0xff] (!%p188_p2)  ;;  %v244_v54 = vld [vmem:[%s2788_s2 + $0x18] sm:$0xff] (!%p188_p2) }
   0xc   : > { %v251_v53 = vld [vmem:[%s2788_s2 + $0x50] sm:$0xff] (!%p188_p2) }
   0xd   : > { %s2793_s19 = smov (!%p215_p3, %s1897_s19), 1 }
   0xe   : > { %s1960_s24 = sshll.u32 %s2793_s19, 5 }
   0xf   : > { %s219_s27 = scalar_lea.vmem %s2786_s0, %s1960_s24  ;;  %295 = vperm.xlu0 %2310, %v249_v10   ;;  %s224_s23 = scalar_lea.vmem %s2791_s5, %s1960_s24 }
  0x10   : > { %v225_v4 = vld [vmem:[%s219_s27] sm:$0xff]  ;;  %v226_v5 = vld [vmem:[%s219_s27 + $0x8] sm:$0xff]  ;;  %v227_v6 = vld [vmem:[%s219_s27 + $0x10] sm:$0xff] }
  0x11   : > { %v2230_v7 = vpack.c.bf16 %v226_v5, %v225_v4  ;;  %v228_v8 = vld [vmem:[%s219_s27 + $0x18] sm:$0xff] }
  0x12   : > { %v2234_v9 = vpack.c.bf16 %v228_v8, %v227_v6 }
  0x13   : > { %2231 = vmatprep.subr.bf16.mxu0 %v2230_v7  ;;  %260 = vperm.xlu0 %2310, %v242_v11  }
  0x14   : > { %2233 = vmatpush3.bf16.msra.mxu0 %v2230_v7 }
  0x15   : > { %2235 = vmatprep.subr.bf16.mxu0 %v2234_v9 }
  0x18   : > { %2237 = vmatpush3.bf16.msra.mxu0 %v2234_v9 }
  0x19   : > { %2250 = vmatprep.subr.bf16.mxu0 %v2393_v57 }
  0x1b   : > { %2067 = vmatmul.mubr.msk.f32.vlgmr.msra.gmra.mrb[0].mxu0 %vm313_vm0, %v230_v12 }
  0x1c   : > { %2069 = vmatprep.mubr.msk.f32.mxu0 %vm313_vm0, %v231_v13 }
  0x1f   : > { %2070 = vmatmul.mubr.msk.f32.gmra.mrb[2].mxu0 %vm313_vm0, %v232_v14 }
  0x20   : > { %2072 = vmatprep.mubr.msk.f32.mxu0 %vm313_vm0, %v233_v15 }
  0x23   : > { %2073 = vmatmul.mubr.msk.f32.gmra.mrb[4].mxu0 %vm313_vm0, %v234_v16 }
  0x24   : > { %2075 = vmatprep.mubr.msk.f32.mxu0 %vm313_vm0, %v235_v17 }
  0x27   : > { %2076 = vmatmul.mubr.msk.f32.gmra.mrb[6].mxu0 %vm313_vm0, %v236_v18 }
  0x28   : > { %2078 = vmatprep.mubr.msk.f32.mxu0 %vm313_vm0, %v237_v19 }
  0x2b   : > { %2079 = vmatmul.mubr.msk.f32.gmra.mrb[8].mxu0 %vm313_vm0, %v238_v20 }
  0x2c   : > { %2081 = vmatprep.mubr.msk.f32.mxu0 %vm313_vm0, %v239_v35 }
  0x2f   : > { %2082 = vmatmul.mubr.msk.f32.gmra.mrb[10].mxu0 %vm313_vm0, %v240_v36 }
  0x30   : > { %2147 = vmatprep.mubr.msk.f32.mxu0 %vm2394_vm2, %v2395_v60 }
  0x86   : > { %v276_v21 = vpop.permute.xlu0 %275 }
  0x8a   : > { %v256_v23 = vpop.permute.xlu0 %255 }
  0x8e   : > { %v2548_v58 = vpop.permute.xlu0 %295 }
  0x92   : > { %v2550_v59 = vpop.permute.xlu0 %260 }
  0xee   : > { %v2494_v22 = vpop.f32.mrb[0].mxu0 }
  0xef   : > { %v416_v24 = vpop.f32.mrb[1].mxu0 }
  0xf0   : > { %v417_v25 = vadd.f32 %v416_v24, %v256_v23 }
  0xf2   : > { %v2496_v26 = vpop.f32.mrb[2].mxu0  ;;  %2084 = vmatprep.subr.mxu1 %v417_v25 }
  0xf3   : > { %v2498_v27 = vpop.f32.mrb[3].mxu0  ;;  %2085 = vmatpush3.msra.mxu1 %v417_v25 }
  0xf4   : > { %2238 = vmatprep.subr.bf16.mxu1 %v2393_v57 }
  0xf6   : > { %v2074_v28 = vpop.f32.mrb[4].mxu0 }
  0xf7   : > { %v436_v29 = vpop.f32.mrb[5].mxu0 }
  0xf8   : > { %v437_v30 = vadd.f32 %v436_v29, %v276_v21 }
  0xfa   : > { %475 = vxpose.xlu1.b32.start.end [1/1] (short) (narrow) %v437_v30, 64  ;;  %v2500_v31 = vpop.f32.mrb[6].mxu0 }
  0xfb   : > { %v2502_v32 = vpop.f32.mrb[7].mxu0 }
  0xfe   : > { %v2080_v33 = vpop.f32.mrb[8].mxu0 }
  0xff   : > { %v2504_v34 = vpop.f32.mrb[9].mxu0 }
 0x102   : > { %v2542_v55 = vpop.f32.mrb[10].mxu0 }
 0x103   : > { %v2544_v56 = vpop.f32.mrb[11].mxu0 }
 0x118   : > { %2311 = vset.pattern.permute.xlu1 %v2392_v1 }
 0x134   : > { %280 = vperm.xlu1 %2311, %v246_v37  }
 0x138   : > { %300 = vperm.xlu1 %2311, %v250_v38  }
 0x13c   : > { %265 = vperm.xlu1 %2311, %v243_v39  }
 0x17a   : > { %v491_v40 = vpop.trf.xlu1 }
 0x17b   : > { %2086 = vmatprep.mubr.msk.f32.mxu1 %vm507_vm1, %v491_v40 }
 0x17e   : > { %v492_v41 = vpop.trf.xlu1 }
 0x17f   : > { %2087 = vmatmul.mubr.msk.f32.vlgmr.msra.gmra.mrb[0].mxu1 %vm507_vm1, %v492_v41 }
 0x182   : > { %v493_v42 = vpop.trf.xlu1 }
 0x183   : > { %2089 = vmatprep.mubr.msk.f32.mxu1 %vm507_vm1, %v493_v42 }
 0x186   : > { %v494_v43 = vpop.trf.xlu1 }
 0x187   : > { %2090 = vmatmul.mubr.msk.f32.gmra.mrb[2].mxu1 %vm507_vm1, %v494_v43 }
 0x18a   : > { %v495_v44 = vpop.trf.xlu1 }
 0x18b   : > { %2092 = vmatprep.mubr.msk.f32.mxu1 %vm507_vm1, %v495_v44 }
 0x18e   : > { %v496_v45 = vpop.trf.xlu1 }
 0x18f   : > { %2093 = vmatmul.mubr.msk.f32.gmra.mrb[4].mxu1 %vm507_vm1, %v496_v45 }
 0x192   : > { %v497_v46 = vpop.trf.xlu1 }
 0x193   : > { %2095 = vmatprep.mubr.msk.f32.mxu1 %vm507_vm1, %v497_v46 }
 0x196   : > { %v498_v47 = vpop.trf.xlu1 }
 0x197   : > { %2096 = vmatmul.mubr.msk.f32.gmra.mrb[6].mxu1 %vm507_vm1, %v498_v47 }
 0x198   : > { %2114 = vmatprep.mubr.msk.f32.mxu1 %vm2394_vm2, %v2395_v60 }
 0x1b3   : > { %v281_v48 = vpop.permute.xlu1 %280 }
 0x1b4   : > { %v442_v49 = vadd.f32 %v2074_v28, %v281_v48 }
 0x1b6   : > { %786 = vxpose.xlu0.b32.start.end [1/1] (short) (narrow) %v442_v49, 64 }
 0x1b7   : > { %v301_v50 = vpop.permute.xlu1 %300 }
 0x1b8   : > { %v2531_v51 = vadd.f32 %v2080_v33, %v301_v50 }
 0x1fb   : > { %285 = vperm.xlu0 %2310, %v247_v52  }
 0x1ff   : > { %305 = vperm.xlu0 %2310, %v251_v53  }
 0x203   : > { %270 = vperm.xlu0 %2310, %v244_v54  }
 0x236   : > { %v2556_v61 = vpop.trf.xlu0 }
 0x23a   : > { %v2558_v62 = vpop.trf.xlu0 }
 0x23e   : > { %v2560_v1 = vpop.trf.xlu0 }
 0x242   : > { %v2562_v4 = vpop.trf.xlu0 }
 0x246   : > { %v2564_v6 = vpop.trf.xlu0 }
 0x24a   : > { %v2570_v15 = vpop.trf.xlu0 }
 0x24e   : > { %v2576_v25 = vpop.trf.xlu0 }
 0x252   : > { %v2088_v63 = vpop.f32.mrb[0].mxu1  ;;  %v2578_v33 = vpop.trf.xlu0 }
 0x253   : > { %v598_v0 = vpop.f32.mrb[1].mxu1  ;;  %v639_v7 = vsel %vm637_vm3, %v2088_v63, -inf }
 0x254   : > { %v638_v10 = vsel %vm637_vm3, %v598_v0, -inf }
 0x25a   : > { %v2091_v2 = vpop.f32.mrb[2].mxu1 }
 0x25b   : > { %v608_v3 = vpop.f32.mrb[3].mxu1  ;;  %v641_v17 = vsel %vm637_vm3, %v2091_v2, -inf }
 0x25c   : > { %v640_v20 = vsel %vm637_vm3, %v608_v3, -inf }
 0x262   : > { %v2094_v5 = vpop.f32.mrb[4].mxu1 }
 0x263   : > { %v644_v8 = vsel %vm637_vm3, %v2094_v5, -inf  ;;  %v618_v9 = vpop.f32.mrb[5].mxu1 }
 0x264   : > { %v645_v11 = vmax.f32 %v639_v7, %v644_v8  ;;  %v642_v12 = vsel %vm637_vm3, %v618_v9, -inf }
 0x265   : > { %v643_v13 = vmax.f32 %v638_v10, %v642_v12 }
 0x267   : > { %v650_v14 = vmax.f32 %v643_v13, %v645_v11 }
 0x26a   : > { %v2097_v16 = vpop.f32.mrb[6].mxu1 }
 0x26b   : > { %v648_v18 = vsel %vm637_vm3, %v2097_v16, -inf  ;;  %v628_v19 = vpop.f32.mrb[7].mxu1 }
 0x26c   : > { %v649_v21 = vmax.f32 %v641_v17, %v648_v18  ;;  %v646_v23 = vsel %vm637_vm3, %v628_v19, -inf }
 0x26d   : > { %v647_v24 = vmax.f32 %v640_v20, %v646_v23 }
 0x26f   : > { %v651_v28 = vmax.f32 %v647_v24, %v649_v21 }
 0x271   : > { %v652_v29 = vmax.f32 %v650_v14, %v651_v28 }
 0x273   : > { %v653_v30 = vrot.slane %v652_v29, 4 }
 0x275   : > { %v654_v35 = vmax.f32 %v652_v29, %v653_v30 }
 0x277   : > { %v655_v36 = vrot.slane %v654_v35, 2 }
 0x279   : > { %v656_v37 = vmax.f32 %v654_v35, %v655_v36 }
 0x27a   : > { %v286_v38 = vpop.permute.xlu0 %285 }
 0x27b   : > { %v657_v39 = vrot.slane %v656_v37, 1  ;;  %v447_v40 = vadd.f32 %v2502_v32, %v286_v38 }
 0x27d   : > { %v658_v41 = vmax.f32 %v656_v37, %v657_v39  ;;  %1095 = vxpose.xlu1.b32.start.end [1/1] (short) (narrow) %v447_v40, 64 }
 0x27f   : > { %v659_v42 = vsub.f32 %v598_v0, %v658_v41  ;;  %v660_v43 = vsub.f32 %v2088_v63, %v658_v41  ;;  %v661_v44 = vsub.f32 %v608_v3, %v658_v41  ;;  %v662_v45 = vsub.f32 %v2091_v2, %v658_v41 }
 0x280   : > { %v663_v46 = vsub.f32 %v618_v9, %v658_v41  ;;  %v664_v47 = vsub.f32 %v2094_v5, %v658_v41  ;;  %v665_v48 = vsub.f32 %v628_v19, %v658_v41  ;;  %v666_v49 = vsub.f32 %v2097_v16, %v658_v41 }
 0x281   : > { %v667_v50 = vmul.f32 1.442695, %v659_v42  ;;  %v669_v52 = vmul.f32 1.442695, %v660_v43  ;;  %v671_v53 = vmul.f32 1.442695, %v661_v44 }
 0x282   : > { %v673_v54 = vmul.f32 1.442695, %v662_v45  ;;  %v675_v7 = vmul.f32 1.442695, %v663_v46  ;;  %v677_v32 = vmul.f32 1.442695, %v664_v47 }
 0x283   : > { %2312 = vpow2.f32 %v667_v50  ;;  %v679_v8 = vmul.f32 1.442695, %v665_v48  ;;  %v681_v63 = vmul.f32 1.442695, %v666_v49  ;;  %v248_v44 = vld [vmem:[%s2788_s2 + $0x38] sm:$0xff] }
 0x284   : > { %2314 = vpow2.f32 %v669_v52 }
 0x285   : > { %2316 = vpow2.f32 %v671_v53 }
 0x286   : > { %2318 = vpow2.f32 %v673_v54 }
 0x287   : > { %2320 = vpow2.f32 %v675_v7 }
 0x288   : > { %2322 = vpow2.f32 %v677_v32  ;;  %v1717_v32 = vld [vmem:[%s2790_s4] sm:$0xff] }
 0x289   : > { %2324 = vpow2.f32 %v679_v8 }
 0x28a   : > { %2326 = vpow2.f32 %v681_v63 }
 0x28d   : > { %v2313_v0 = vpop.eup %2312 }
 0x28e   : > { %v2315_v2 = vpop.eup %2314  ;;  %v683_v3 = vsel %vm637_vm3, %v2313_v0, 0.0 }
 0x28f   : > { %v2317_v5 = vpop.eup %2316  ;;  %v684_v9 = vsel %vm637_vm3, %v2315_v2, 0.0 }
 0x290   : > { %v2319_v10 = vpop.eup %2318  ;;  %v685_v11 = vadd.f32 %v684_v9, %v683_v3  ;;  %v686_v12 = vsel %vm637_vm3, %v2317_v5, 0.0  ;;  %v422_v3 = vadd.f32 %v2494_v22, %v2550_v59  ;;  %v457_v9 = vadd.f32 %v2504_v34, %v2548_v58  ;;  %v2631_v22 = vpop.permute.xlu1 %265 }
 0x291   : > { %v2321_v13 = vpop.eup %2320  ;;  %v688_v16 = vsel %vm637_vm3, %v2319_v10, 0.0 }
 0x292   : > { %v687_v14 = vadd.f32 %v686_v12, %v685_v11  ;;  %v2323_v17 = vpop.eup %2322  ;;  %v690_v19 = vsel %vm637_vm3, %v2321_v13, 0.0 }
 0x293   : > { %v2325_v20 = vpop.eup %2324  ;;  %v692_v23 = vsel %vm637_vm3, %v2323_v17, 0.0 }
 0x294   : > { %v689_v18 = vadd.f32 %v688_v16, %v687_v14  ;;  %v2327_v24 = vpop.eup %2326  ;;  %v694_v29 = vsel %vm637_vm3, %v2325_v20, 0.0 }
 0x295   : > { %v696_v35 = vsel %vm637_vm3, %v2327_v24, 0.0 }
 0x296   : > { %v691_v21 = vadd.f32 %v690_v19, %v689_v18 }
 0x298   : > { %v693_v28 = vadd.f32 %v692_v23, %v691_v21 }
 0x29a   : > { %v695_v30 = vadd.f32 %v694_v29, %v693_v28 }
 0x29c   : > { %v697_v36 = vadd.f32 %v696_v35, %v695_v30 }
 0x29e   : > { %v698_v37 = vrot.slane %v697_v36, 4 }
 0x2a0   : > { %v699_v38 = vadd.f32 %v698_v37, %v697_v36 }
 0x2a2   : > { %v700_v39 = vrot.slane %v699_v38, 2 }
 0x2a4   : > { %v701_v40 = vadd.f32 %v700_v39, %v699_v38 }
 0x2a6   : > { %v702_v41 = vrot.slane %v701_v40, 1 }
 0x2a8   : > { %v703_v42 = vadd.f32 %v702_v41, %v701_v40 }
 0x2aa   : > { %2328 = vrcp.f32 %v703_v42 }
 0x2b4   : > { %v2329_v43 = vpop.eup %2328 }
 0x2b5   : > { %v705_v45 = vmul.f32 %v2329_v43, %v2313_v0  ;;  %v706_v46 = vmul.f32 %v2329_v43, %v2315_v2  ;;  %v707_v47 = vmul.f32 %v2329_v43, %v2317_v5  ;;  %v708_v48 = vmul.f32 %v2329_v43, %v2319_v10  ;;  %v1718_v0 = vld [vmem:[%s2790_s4 + $0x8] sm:$0xff]  ;;  %v1719_v2 = vld [vmem:[%s2790_s4 + $0x10] sm:$0xff]  ;;  %v1720_v5 = vld [vmem:[%s2790_s4 + $0x18] sm:$0xff] }
 0x2b6   : > { %v709_v49 = vmul.f32 %v2329_v43, %v2321_v13  ;;  %v710_v50 = vmul.f32 %v2329_v43, %v2323_v17  ;;  %v711_v52 = vmul.f32 %v2329_v43, %v2325_v20  ;;  %v712_v53 = vmul.f32 %v2329_v43, %v2327_v24 }
 0x2b7   : > { %290 = vperm.xlu1 %2311, %v248_v44   ;;  %v2239_v54 = vpack.c.bf16 %v706_v46, %v705_v45  ;;  %v2242_v7 = vpack.c.bf16 %v708_v48, %v707_v47 }
 0x2b8   : > { %v2245_v8 = vpack.c.bf16 %v710_v50, %v709_v49  ;;  %v2248_v63 = vpack.c.bf16 %v712_v53, %v711_v52 }
 0x2b9   : > { %2240 = vmatpush3.bf16.msra.mxu1 %v2239_v54 }
 0x2ba   : > { %2241 = vmatprep.subr.bf16.mxu1 %v2393_v57 }
 0x2bb   : > { %1723 = vperm.xlu1 %2311, %v1717_v32  }
 0x2bd   : > { %2243 = vmatpush3.bf16.msra.mxu1 %v2242_v7 }
 0x2be   : > { %2244 = vmatprep.subr.bf16.mxu1 %v2393_v57 }
 0x2bf   : > { %1728 = vperm.xlu1 %2311, %v1718_v0  }
 0x2c1   : > { %2246 = vmatpush3.bf16.msra.mxu1 %v2245_v8 }
 0x2c2   : > { %2247 = vmatprep.subr.bf16.mxu1 %v2393_v57 }
 0x2c3   : > { %1733 = vperm.xlu1 %2311, %v1719_v2  }
 0x2c5   : > { %2249 = vmatpush3.bf16.msra.mxu1 %v2248_v63 }
 0x2c6   : > { %2117 = vmatprep.subr.mxu1 %v422_v3 }
 0x2c7   : > { %1738 = vperm.xlu1 %2311, %v1720_v5  }
 0x2c8   : > { %2115 = vmatmul.mubr.msk.f32.vlgmr.msra.gmra.mrb[8].mxu1 %vm637_vm3, %v457_v9 }
 0x2c9   : > { %2118 = vmatpush3.msra.mxu1 %v422_v3  ;;  %2119 = vmatprep.mubr.msk.f32.mxu1 %vm507_vm1, %v2556_v61 }
 0x2ca   : > { %2262 = vmatprep.subr.bf16.mxu1 %v2393_v57 }
 0x2cc   : > { %2120 = vmatmul.mubr.msk.f32.vlgmr.msra.gmra.mrb[10].mxu1 %vm507_vm1, %v2558_v62 }
 0x2cd   : > { %2122 = vmatprep.mubr.msk.f32.mxu1 %vm507_vm1, %v2560_v1 }
 0x2d0   : > { %2123 = vmatmul.mubr.msk.f32.gmra.mrb[12].mxu1 %vm507_vm1, %v2562_v4 }
 0x2d1   : > { %2125 = vmatprep.mubr.msk.f32.mxu1 %vm507_vm1, %v2564_v6 }
 0x2d4   : > { %2126 = vmatmul.mubr.msk.f32.gmra.mrb[14].mxu1 %vm507_vm1, %v2570_v15 }
 0x2d5   : > { %2128 = vmatprep.mubr.msk.f32.mxu1 %vm507_vm1, %v2576_v25 }
 0x2d8   : > { %2129 = vmatmul.mubr.msk.f32.gmra.mrb[16].mxu1 %vm507_vm1, %v2578_v33  ;;  %v252_v33 = vld [vmem:[%s2788_s2 + $0x58] sm:$0xff] }
 0x2d9   : > { %2180 = vmatprep.mubr.msk.f32.mxu1 %vm2394_vm2, %v2395_v60 }
 0x2fd   : > { %v2633_v34 = vpop.trf.xlu1 }
 0x301   : > { %v2635_v58 = vpop.trf.xlu1 }
 0x305   : > { %v2637_v59 = vpop.trf.xlu1 }
 0x309   : > { %v2639_v61 = vpop.trf.xlu1 }
 0x30d   : > { %v2641_v62 = vpop.trf.xlu1 }
 0x311   : > { %v2643_v1 = vpop.trf.xlu1 }
 0x315   : > { %v2645_v4 = vpop.trf.xlu1 }
 0x319   : > { %v2647_v6 = vpop.trf.xlu1 }
 0x336   : > { %v291_v15 = vpop.permute.xlu1 %290 }
 0x337   : > { %v452_v25 = vadd.f32 %v2500_v31, %v291_v15 }
 0x339   : > { %1404 = vxpose.xlu0.b32.start.end [1/1] (short) (narrow) %v452_v25, 64 }
 0x37e   : > { %310 = vperm.xlu0 %2310, %v252_v33  }
 0x39b   : > { %v2653_v10 = vpop.f32.mrb[8].mxu1 }
 0x39c   : > { %v2116_v11 = vpop.f32.mrb[9].mxu1 }
 0x39f   : > { %v2121_v12 = vpop.f32.mrb[10].mxu1 }
 0x3a0   : > { %v908_v13 = vpop.f32.mrb[11].mxu1  ;;  %v948_v18 = vsel %vm637_vm3, %v2121_v12, -inf }
 0x3a1   : > { %v947_v31 = vsel %vm637_vm3, %v908_v13, -inf }
 0x3a3   : > { %v2124_v14 = vpop.f32.mrb[12].mxu1 }
 0x3a4   : > { %v918_v16 = vpop.f32.mrb[13].mxu1  ;;  %v950_v29 = vsel %vm637_vm3, %v2124_v14, -inf }
 0x3a5   : > { %v949_v37 = vsel %vm637_vm3, %v918_v16, -inf }
 0x3a7   : > { %v2127_v17 = vpop.f32.mrb[14].mxu1 }
 0x3a8   : > { %v953_v19 = vsel %vm637_vm3, %v2127_v17, -inf  ;;  %v928_v20 = vpop.f32.mrb[15].mxu1 }
 0x3a9   : > { %v954_v21 = vmax.f32 %v948_v18, %v953_v19  ;;  %v951_v23 = vsel %vm637_vm3, %v928_v20, -inf }
 0x3aa   : > { %v952_v24 = vmax.f32 %v947_v31, %v951_v23 }
 0x3ab   : > { %v2130_v28 = vpop.f32.mrb[16].mxu1 }
 0x3ac   : > { %v959_v30 = vmax.f32 %v952_v24, %v954_v21  ;;  %v957_v35 = vsel %vm637_vm3, %v2130_v28, -inf  ;;  %v938_v36 = vpop.f32.mrb[17].mxu1 }
 0x3ad   : > { %v958_v38 = vmax.f32 %v950_v29, %v957_v35  ;;  %v955_v39 = vsel %vm637_vm3, %v938_v36, -inf }
 0x3ae   : > { %v956_v40 = vmax.f32 %v949_v37, %v955_v39 }
 0x3b0   : > { %v960_v41 = vmax.f32 %v956_v40, %v958_v38 }
 0x3b2   : > { %v961_v42 = vmax.f32 %v959_v30, %v960_v41 }
 0x3b4   : > { %v962_v43 = vrot.slane %v961_v42, 4 }
 0x3b6   : > { %v963_v44 = vmax.f32 %v961_v42, %v962_v43 }
 0x3b8   : > { %v964_v45 = vrot.slane %v963_v44, 2 }
 0x3ba   : > { %v965_v46 = vmax.f32 %v963_v44, %v964_v45 }
 0x3bc   : > { %v966_v47 = vrot.slane %v965_v46, 1 }
 0x3be   : > { %v967_v48 = vmax.f32 %v965_v46, %v966_v47 }
 0x3c0   : > { %v968_v49 = vsub.f32 %v908_v13, %v967_v48  ;;  %v969_v50 = vsub.f32 %v2121_v12, %v967_v48  ;;  %v970_v52 = vsub.f32 %v918_v16, %v967_v48  ;;  %v971_v53 = vsub.f32 %v2124_v14, %v967_v48 }
 0x3c1   : > { %v972_v54 = vsub.f32 %v928_v20, %v967_v48  ;;  %v973_v7 = vsub.f32 %v2127_v17, %v967_v48  ;;  %v974_v32 = vsub.f32 %v938_v36, %v967_v48  ;;  %v975_v8 = vsub.f32 %v2130_v28, %v967_v48 }
 0x3c2   : > { %v976_v63 = vmul.f32 1.442695, %v968_v49  ;;  %v978_v0 = vmul.f32 1.442695, %v969_v50  ;;  %v980_v2 = vmul.f32 1.442695, %v970_v52 }
 0x3c3   : > { %v982_v3 = vmul.f32 1.442695, %v971_v53  ;;  %v984_v5 = vmul.f32 1.442695, %v972_v54  ;;  %v986_v9 = vmul.f32 1.442695, %v973_v7 }
 0x3c4   : > { %2330 = vpow2.f32 %v976_v63  ;;  %v988_v15 = vmul.f32 1.442695, %v974_v32  ;;  %v990_v25 = vmul.f32 1.442695, %v975_v8 }
 0x3c5   : > { %2332 = vpow2.f32 %v978_v0 }
 0x3c6   : > { %2334 = vpow2.f32 %v980_v2 }
 0x3c7   : > { %2336 = vpow2.f32 %v982_v3  ;;  %v427_v3 = vadd.f32 %v2498_v27, %v2631_v22 }
 0x3c8   : > { %2338 = vpow2.f32 %v984_v5 }
 0x3c9   : > { %2340 = vpow2.f32 %v986_v9 }
 0x3ca   : > { %2342 = vpow2.f32 %v988_v15 }
 0x3cb   : > { %2344 = vpow2.f32 %v990_v25 }
 0x3ce   : > { %v2331_v33 = vpop.eup %2330 }
 0x3cf   : > { %v2333_v11 = vpop.eup %2332  ;;  %v992_v12 = vsel %vm637_vm3, %v2331_v33, 0.0 }
 0x3d0   : > { %v2335_v13 = vpop.eup %2334  ;;  %v993_v14 = vsel %vm637_vm3, %v2333_v11, 0.0 }
 0x3d1   : > { %v2337_v16 = vpop.eup %2336  ;;  %v994_v17 = vadd.f32 %v993_v14, %v992_v12  ;;  %v995_v18 = vsel %vm637_vm3, %v2335_v13, 0.0 }
 0x3d2   : > { %v2339_v19 = vpop.eup %2338  ;;  %v997_v31 = vsel %vm637_vm3, %v2337_v16, 0.0 }
 0x3d3   : > { %v996_v20 = vadd.f32 %v995_v18, %v994_v17  ;;  %v2341_v21 = vpop.eup %2340  ;;  %v999_v24 = vsel %vm637_vm3, %v2339_v19, 0.0 }
 0x3d4   : > { %v2343_v28 = vpop.eup %2342  ;;  %v1001_v30 = vsel %vm637_vm3, %v2341_v21, 0.0 }
 0x3d5   : > { %v998_v23 = vadd.f32 %v997_v31, %v996_v20  ;;  %v2345_v35 = vpop.eup %2344  ;;  %v1003_v37 = vsel %vm637_vm3, %v2343_v28, 0.0 }
 0x3d6   : > { %v1005_v39 = vsel %vm637_vm3, %v2345_v35, 0.0 }
 0x3d7   : > { %v1000_v29 = vadd.f32 %v999_v24, %v998_v23 }
 0x3d9   : > { %v1002_v36 = vadd.f32 %v1001_v30, %v1000_v29 }
 0x3db   : > { %v1004_v38 = vadd.f32 %v1003_v37, %v1002_v36 }
 0x3dd   : > { %v1006_v40 = vadd.f32 %v1005_v39, %v1004_v38 }
 0x3df   : > { %v1007_v41 = vrot.slane %v1006_v40, 4 }
 0x3e1   : > { %v1008_v42 = vadd.f32 %v1007_v41, %v1006_v40 }
 0x3e3   : > { %v1009_v43 = vrot.slane %v1008_v42, 2 }
 0x3e5   : > { %v1010_v44 = vadd.f32 %v1009_v43, %v1008_v42 }
 0x3e7   : > { %v1011_v45 = vrot.slane %v1010_v44, 1 }
 0x3e9   : > { %v1012_v46 = vadd.f32 %v1011_v45, %v1010_v44 }
 0x3eb   : > { %2346 = vrcp.f32 %v1012_v46 }
 0x3f5   : > { %v2347_v47 = vpop.eup %2346 }
 0x3f6   : > { %v1014_v48 = vmul.f32 %v2347_v47, %v2331_v33  ;;  %v1015_v49 = vmul.f32 %v2347_v47, %v2333_v11  ;;  %v1016_v50 = vmul.f32 %v2347_v47, %v2335_v13  ;;  %v1017_v52 = vmul.f32 %v2347_v47, %v2337_v16 }
 0x3f7   : > { %v1018_v53 = vmul.f32 %v2347_v47, %v2339_v19  ;;  %v1019_v54 = vmul.f32 %v2347_v47, %v2341_v21  ;;  %v1020_v7 = vmul.f32 %v2347_v47, %v2343_v28  ;;  %v1021_v32 = vmul.f32 %v2347_v47, %v2345_v35 }
 0x3f8   : > { %v2251_v8 = vpack.c.bf16 %v1015_v49, %v1014_v48  ;;  %v2254_v63 = vpack.c.bf16 %v1017_v52, %v1016_v50 }
 0x3f9   : > { %v2257_v0 = vpack.c.bf16 %v1019_v54, %v1018_v53  ;;  %v2260_v2 = vpack.c.bf16 %v1021_v32, %v1020_v7 }
 0x3fa   : > { %2252 = vmatpush3.bf16.msra.mxu0 %v2251_v8 }
 0x3fb   : > { %2253 = vmatprep.subr.bf16.mxu0 %v2393_v57 }
 0x3fe   : > { %2255 = vmatpush3.bf16.msra.mxu0 %v2254_v63 }
 0x3ff   : > { %2256 = vmatprep.subr.bf16.mxu0 %v2393_v57 }
 0x402   : > { %2258 = vmatpush3.bf16.msra.mxu0 %v2257_v0 }
 0x403   : > { %2259 = vmatprep.subr.bf16.mxu0 %v2393_v57 }
 0x406   : > { %2261 = vmatpush3.bf16.msra.mxu0 %v2260_v2 }
 0x407   : > { %2150 = vmatprep.subr.mxu0 %v427_v3 }
 0x409   : > { %2148 = vmatmul.mubr.msk.f32.vlgmr.msra.gmra.mrb[12].mxu0 %vm637_vm3, %v2531_v51 }
 0x40a   : > { %2151 = vmatpush3.msra.mxu0 %v427_v3  ;;  %2152 = vmatprep.mubr.msk.f32.mxu0 %vm507_vm1, %v2633_v34 }
 0x40b   : > { %2274 = vmatprep.subr.bf16.mxu0 %v2393_v57 }
 0x40d   : > { %2153 = vmatmul.mubr.msk.f32.vlgmr.msra.gmra.mrb[14].mxu0 %vm507_vm1, %v2635_v58 }
 0x40e   : > { %2155 = vmatprep.mubr.msk.f32.mxu0 %vm507_vm1, %v2637_v59 }
 0x411   : > { %2156 = vmatmul.mubr.msk.f32.gmra.mrb[16].mxu0 %vm507_vm1, %v2639_v61 }
 0x412   : > { %2158 = vmatprep.mubr.msk.f32.mxu0 %vm507_vm1, %v2641_v62 }
 0x415   : > { %2159 = vmatmul.mubr.msk.f32.gmra.mrb[18].mxu0 %vm507_vm1, %v2643_v1 }
 0x416   : > { %2161 = vmatprep.mubr.msk.f32.mxu0 %vm507_vm1, %v2645_v4 }
 0x419   : > { %2162 = vmatmul.mubr.msk.f32.gmra.mrb[20].mxu0 %vm507_vm1, %v2647_v6 }
 0x41a   : > { %2213 = vmatprep.mubr.msk.f32.mxu0 %vm2394_vm2, %v2395_v60 }
 0x4dc   : > { %v1091_v27 = vpop.f32.mrb[12].mxu0 }
 0x4dd   : > { %v2698_v51 = vpack.c.bf16 %v1091_v27, %v2653_v10  ;;  %v2149_v22 = vpop.f32.mrb[13].mxu0 }
 0x4e0   : > { %v2154_v34 = vpop.f32.mrb[14].mxu0 }
 0x4e1   : > { %v1217_v58 = vpop.f32.mrb[15].mxu0  ;;  %v1257_v1 = vsel %vm637_vm3, %v2154_v34, -inf }
 0x4e2   : > { %v1256_v6 = vsel %vm637_vm3, %v1217_v58, -inf }
 0x4e4   : > { %v2157_v59 = vpop.f32.mrb[16].mxu0 }
 0x4e5   : > { %v1227_v61 = vpop.f32.mrb[17].mxu0  ;;  %v1259_v10 = vsel %vm637_vm3, %v2157_v59, -inf }
 0x4e6   : > { %v1258_v13 = vsel %vm637_vm3, %v1227_v61, -inf }
 0x4e8   : > { %v2160_v62 = vpop.f32.mrb[18].mxu0 }
 0x4e9   : > { %v1262_v4 = vsel %vm637_vm3, %v2160_v62, -inf  ;;  %v1237_v5 = vpop.f32.mrb[19].mxu0 }
 0x4ea   : > { %v1263_v9 = vmax.f32 %v1257_v1, %v1262_v4  ;;  %v1260_v60 = vsel %vm637_vm3, %v1237_v5, -inf }
 0x4eb   : > { %v1261_v15 = vmax.f32 %v1256_v6, %v1260_v60 }
 0x4ec   : > { %v2163_v25 = vpop.f32.mrb[20].mxu0 }
 0x4ed   : > { %v1268_v33 = vmax.f32 %v1261_v15, %v1263_v9  ;;  %v1266_v11 = vsel %vm637_vm3, %v2163_v25, -inf  ;;  %v1247_v12 = vpop.f32.mrb[21].mxu0 }
 0x4ee   : > { %v1267_v14 = vmax.f32 %v1259_v10, %v1266_v11  ;;  %v1264_v16 = vsel %vm637_vm3, %v1247_v12, -inf }
 0x4ef   : > { %v1265_v17 = vmax.f32 %v1258_v13, %v1264_v16 }
 0x4f1   : > { %v1269_v18 = vmax.f32 %v1265_v17, %v1267_v14 }
 0x4f3   : > { %v1270_v19 = vmax.f32 %v1268_v33, %v1269_v18 }
 0x4f5   : > { %v1271_v20 = vrot.slane %v1270_v19, 4 }
 0x4f7   : > { %v1272_v31 = vmax.f32 %v1270_v19, %v1271_v20 }
 0x4f9   : > { %v1273_v21 = vrot.slane %v1272_v31, 2 }
 0x4fb   : > { %v1274_v23 = vmax.f32 %v1272_v31, %v1273_v21 }
 0x4fd   : > { %v1275_v24 = vrot.slane %v1274_v23, 1 }
 0x4ff   : > { %v1276_v28 = vmax.f32 %v1274_v23, %v1275_v24 }
 0x501   : > { %v1277_v29 = vsub.f32 %v1217_v58, %v1276_v28  ;;  %v1278_v30 = vsub.f32 %v2154_v34, %v1276_v28  ;;  %v1279_v35 = vsub.f32 %v1227_v61, %v1276_v28  ;;  %v1280_v36 = vsub.f32 %v2157_v59, %v1276_v28 }
 0x502   : > { %v1281_v37 = vsub.f32 %v1237_v5, %v1276_v28  ;;  %v1282_v38 = vsub.f32 %v2160_v62, %v1276_v28  ;;  %v1283_v39 = vsub.f32 %v1247_v12, %v1276_v28  ;;  %v1284_v40 = vsub.f32 %v2163_v25, %v1276_v28  ;;  %v306_v25 = vpop.permute.xlu0 %305 }
 0x503   : > { %v1285_v41 = vmul.f32 1.442695, %v1277_v29  ;;  %v1287_v42 = vmul.f32 1.442695, %v1278_v30  ;;  %v1289_v43 = vmul.f32 1.442695, %v1279_v35 }
 0x504   : > { %v1291_v44 = vmul.f32 1.442695, %v1280_v36  ;;  %v1293_v45 = vmul.f32 1.442695, %v1281_v37  ;;  %v1295_v46 = vmul.f32 1.442695, %v1282_v38 }
 0x505   : > { %2348 = vpow2.f32 %v1285_v41  ;;  %v1297_v47 = vmul.f32 1.442695, %v1283_v39  ;;  %v1299_v48 = vmul.f32 1.442695, %v1284_v40  ;;  %v467_v40 = vadd.f32 %v2544_v56, %v306_v25 }
 0x506   : > { %2350 = vpow2.f32 %v1287_v42  ;;  %v271_v12 = vpop.permute.xlu0 %270 }
 0x507   : > { %2352 = vpow2.f32 %v1289_v43  ;;  %v432_v38 = vadd.f32 %v2496_v26, %v271_v12 }
 0x508   : > { %2354 = vpow2.f32 %v1291_v44 }
 0x509   : > { %2356 = vpow2.f32 %v1293_v45 }
 0x50a   : > { %2358 = vpow2.f32 %v1295_v46  ;;  %v1420_v13 = vpop.trf.xlu0 }
 0x50b   : > { %2360 = vpow2.f32 %v1297_v47 }
 0x50c   : > { %2362 = vpow2.f32 %v1299_v48 }
 0x50e   : > { %v1421_v14 = vpop.trf.xlu0 }
 0x50f   : > { %v2349_v49 = vpop.eup %2348 }
 0x510   : > { %v2351_v50 = vpop.eup %2350  ;;  %v1301_v52 = vsel %vm637_vm3, %v2349_v49, 0.0 }
 0x511   : > { %v2353_v53 = vpop.eup %2352  ;;  %v1302_v54 = vsel %vm637_vm3, %v2351_v50, 0.0 }
 0x512   : > { %v2355_v7 = vpop.eup %2354  ;;  %v1303_v32 = vadd.f32 %v1302_v54, %v1301_v52  ;;  %v1304_v8 = vsel %vm637_vm3, %v2353_v53, 0.0  ;;  %v1422_v36 = vpop.trf.xlu0 }
 0x513   : > { %v2357_v63 = vpop.eup %2356  ;;  %v1306_v2 = vsel %vm637_vm3, %v2355_v7, 0.0 }
 0x514   : > { %v1305_v0 = vadd.f32 %v1304_v8, %v1303_v32  ;;  %v2359_v3 = vpop.eup %2358  ;;  %v1308_v22 = vsel %vm637_vm3, %v2357_v63, 0.0 }
 0x515   : > { %v2361_v34 = vpop.eup %2360  ;;  %v1310_v59 = vsel %vm637_vm3, %v2359_v3, 0.0 }
 0x516   : > { %v1307_v27 = vadd.f32 %v1306_v2, %v1305_v0  ;;  %v2363_v61 = vpop.eup %2362  ;;  %v1312_v1 = vsel %vm637_vm3, %v2361_v34, 0.0  ;;  %v1423_v37 = vpop.trf.xlu0 }
 0x517   : > { %v1314_v5 = vsel %vm637_vm3, %v2363_v61, 0.0 }
 0x518   : > { %v1309_v58 = vadd.f32 %v1308_v22, %v1307_v27 }
 0x51a   : > { %v1311_v62 = vadd.f32 %v1310_v59, %v1309_v58  ;;  %v1424_v39 = vpop.trf.xlu0 }
 0x51c   : > { %v1313_v4 = vadd.f32 %v1312_v1, %v1311_v62 }
 0x51e   : > { %v1315_v6 = vadd.f32 %v1314_v5, %v1313_v4  ;;  %v1425_v41 = vpop.trf.xlu0 }
 0x520   : > { %v1316_v9 = vrot.slane %v1315_v6, 4 }
 0x522   : > { %v1317_v60 = vadd.f32 %v1316_v9, %v1315_v6  ;;  %v1426_v26 = vpop.trf.xlu0 }
 0x524   : > { %v1318_v15 = vrot.slane %v1317_v60, 2 }
 0x526   : > { %v1319_v10 = vadd.f32 %v1318_v15, %v1317_v60  ;;  %v1427_v56 = vpop.trf.xlu0 }
 0x528   : > { %v1320_v33 = vrot.slane %v1319_v10, 1 }
 0x52a   : > { %v1321_v11 = vadd.f32 %v1320_v33, %v1319_v10 }
 0x52c   : > { %2364 = vrcp.f32 %v1321_v11 }
 0x536   : > { %v2365_v16 = vpop.eup %2364 }
 0x537   : > { %v1323_v17 = vmul.f32 %v2365_v16, %v2349_v49  ;;  %v1324_v18 = vmul.f32 %v2365_v16, %v2351_v50  ;;  %v1325_v19 = vmul.f32 %v2365_v16, %v2353_v53  ;;  %v1326_v20 = vmul.f32 %v2365_v16, %v2355_v7 }
 0x538   : > { %v1327_v31 = vmul.f32 %v2365_v16, %v2357_v63  ;;  %v1328_v21 = vmul.f32 %v2365_v16, %v2359_v3  ;;  %v1329_v23 = vmul.f32 %v2365_v16, %v2361_v34  ;;  %v1330_v24 = vmul.f32 %v2365_v16, %v2363_v61 }
 0x539   : > { %v2263_v28 = vpack.c.bf16 %v1324_v18, %v1323_v17  ;;  %v2266_v29 = vpack.c.bf16 %v1326_v20, %v1325_v19 }
 0x53a   : > { %v2269_v30 = vpack.c.bf16 %v1328_v21, %v1327_v31  ;;  %v2272_v35 = vpack.c.bf16 %v1330_v24, %v1329_v23 }
 0x53b   : > { %2264 = vmatpush3.bf16.msra.mxu1 %v2263_v28 }
 0x53c   : > { %2265 = vmatprep.subr.bf16.mxu1 %v2393_v57 }
 0x53f   : > { %2267 = vmatpush3.bf16.msra.mxu1 %v2266_v29 }
 0x540   : > { %2268 = vmatprep.subr.bf16.mxu1 %v2393_v57 }
 0x543   : > { %2270 = vmatpush3.bf16.msra.mxu1 %v2269_v30 }
 0x544   : > { %2271 = vmatprep.subr.bf16.mxu1 %v2393_v57 }
 0x547   : > { %2273 = vmatpush3.bf16.msra.mxu1 %v2272_v35 }
 0x548   : > { %2183 = vmatprep.subr.mxu1 %v432_v38 }
 0x54a   : > { %2181 = vmatmul.mubr.msk.f32.vlgmr.msra.gmra.mrb[18].mxu1 %vm637_vm3, %v467_v40 }
 0x54b   : > { %2184 = vmatpush3.msra.mxu1 %v432_v38  ;;  %2185 = vmatprep.mubr.msk.f32.mxu1 %vm507_vm1, %v1420_v13 }
 0x54c   : > { %2294 = vmatprep.subr.bf16.mxu1 %v2698_v51 }
 0x54e   : > { %2186 = vmatmul.mubr.msk.f32.vlgmr.msra.gmra.mrb[20].mxu1 %vm507_vm1, %v1421_v14 }
 0x54f   : > { %2296 = vmatpush3.bf16.msra.mxu1 %v2698_v51  ;;  %2188 = vmatprep.mubr.msk.f32.mxu1 %vm507_vm1, %v1422_v36 }
 0x552   : > { %2189 = vmatmul.mubr.msk.f32.gmra.mrb[22].mxu1 %vm507_vm1, %v1423_v37 }
 0x553   : > { %2191 = vmatprep.mubr.msk.f32.mxu1 %vm507_vm1, %v1424_v39 }
 0x556   : > { %2192 = vmatmul.mubr.msk.f32.gmra.mrb[24].mxu1 %vm507_vm1, %v1425_v41 }
 0x557   : > { %2194 = vmatprep.mubr.msk.f32.mxu1 %vm507_vm1, %v1426_v26 }
 0x55a   : > { %2195 = vmatmul.mubr.msk.f32.gmra.mrb[26].mxu1 %vm507_vm1, %v1427_v56 }
 0x61d   : > { %v2732_v42 = vpop.f32.mrb[18].mxu1 }
 0x61e   : > { %v2182_v43 = vpop.f32.mrb[19].mxu1 }
 0x621   : > { %v2187_v44 = vpop.f32.mrb[20].mxu1 }
 0x622   : > { %v1526_v45 = vpop.f32.mrb[21].mxu1  ;;  %v1566_v49 = vsel %vm637_vm3, %v2187_v44, -inf }
 0x623   : > { %v1565_v53 = vsel %vm637_vm3, %v1526_v45, -inf }
 0x625   : > { %v2190_v46 = vpop.f32.mrb[22].mxu1 }
 0x626   : > { %v1536_v47 = vpop.f32.mrb[23].mxu1  ;;  %v1568_v63 = vsel %vm637_vm3, %v2190_v46, -inf }
 0x627   : > { %v1567_v27 = vsel %vm637_vm3, %v1536_v47, -inf }
 0x629   : > { %v2193_v48 = vpop.f32.mrb[24].mxu1 }
 0x62a   : > { %v1571_v50 = vsel %vm637_vm3, %v2193_v48, -inf  ;;  %v1546_v52 = vpop.f32.mrb[25].mxu1 }
 0x62b   : > { %v1572_v54 = vmax.f32 %v1566_v49, %v1571_v50  ;;  %v1569_v7 = vsel %vm637_vm3, %v1546_v52, -inf }
 0x62c   : > { %v1570_v32 = vmax.f32 %v1565_v53, %v1569_v7 }
 0x62d   : > { %v2196_v8 = vpop.f32.mrb[26].mxu1 }
 0x62e   : > { %v1577_v0 = vmax.f32 %v1570_v32, %v1572_v54  ;;  %v1575_v2 = vsel %vm637_vm3, %v2196_v8, -inf  ;;  %v1556_v3 = vpop.f32.mrb[27].mxu1 }
 0x62f   : > { %v1576_v22 = vmax.f32 %v1568_v63, %v1575_v2  ;;  %v1573_v34 = vsel %vm637_vm3, %v1556_v3, -inf }
 0x630   : > { %v1574_v58 = vmax.f32 %v1567_v27, %v1573_v34 }
 0x632   : > { %v1578_v59 = vmax.f32 %v1574_v58, %v1576_v22 }
 0x634   : > { %v1579_v61 = vmax.f32 %v1577_v0, %v1578_v59 }
 0x636   : > { %v1580_v62 = vrot.slane %v1579_v61, 4 }
 0x638   : > { %v1581_v1 = vmax.f32 %v1579_v61, %v1580_v62 }
 0x63a   : > { %v1582_v4 = vrot.slane %v1581_v1, 2 }
 0x63c   : > { %v1583_v5 = vmax.f32 %v1581_v1, %v1582_v4 }
 0x63e   : > { %v1584_v6 = vrot.slane %v1583_v5, 1 }
 0x640   : > { %v1585_v9 = vmax.f32 %v1583_v5, %v1584_v6  ;;  %v311_v6 = vpop.permute.xlu0 %310 }
 0x642   : > { %v1586_v60 = vsub.f32 %v1526_v45, %v1585_v9  ;;  %v1587_v15 = vsub.f32 %v2187_v44, %v1585_v9  ;;  %v1588_v25 = vsub.f32 %v1536_v47, %v1585_v9  ;;  %v1589_v10 = vsub.f32 %v2190_v46, %v1585_v9 }
 0x643   : > { %v1590_v33 = vsub.f32 %v1546_v52, %v1585_v9  ;;  %v1591_v11 = vsub.f32 %v2193_v48, %v1585_v9  ;;  %v1592_v12 = vsub.f32 %v1556_v3, %v1585_v9  ;;  %v1593_v13 = vsub.f32 %v2196_v8, %v1585_v9 }
 0x644   : > { %v1594_v14 = vmul.f32 1.442695, %v1586_v60  ;;  %v1596_v16 = vmul.f32 1.442695, %v1587_v15  ;;  %v1598_v17 = vmul.f32 1.442695, %v1588_v25  ;;  %v472_v9 = vadd.f32 %v2542_v55, %v311_v6 }
 0x645   : > { %v1600_v18 = vmul.f32 1.442695, %v1589_v10  ;;  %v1602_v19 = vmul.f32 1.442695, %v1590_v33  ;;  %v1604_v20 = vmul.f32 1.442695, %v1591_v11  ;;  %v1724_v33 = vpop.permute.xlu1 %1723 }
 0x646   : > { %2366 = vpow2.f32 %v1594_v14  ;;  %v1606_v31 = vmul.f32 1.442695, %v1592_v12  ;;  %v1608_v21 = vmul.f32 1.442695, %v1593_v13  ;;  %v1713_v60 = vld [vmem:[%s2789_s3] sm:$0xff]  ;;  %v1715_v15 = vld [vmem:[%s2789_s3 + $0x10] sm:$0xff] }
 0x647   : > { %2368 = vpow2.f32 %v1596_v16  ;;  %2227 = vmatprep.mubr.msk.f32.mxu1 %vm313_vm0, %v1715_v15  ;;  %v1716_v10 = vld [vmem:[%s2789_s3 + $0x18] sm:$0xff] }
 0x648   : > { %2370 = vpow2.f32 %v1598_v17 }
 0x649   : > { %2372 = vpow2.f32 %v1600_v18  ;;  %v1729_v11 = vpop.permute.xlu1 %1728 }
 0x64a   : > { %2374 = vpow2.f32 %v1602_v19 }
 0x64b   : > { %2376 = vpow2.f32 %v1604_v20 }
 0x64c   : > { %2378 = vpow2.f32 %v1606_v31 }
 0x64d   : > { %2380 = vpow2.f32 %v1608_v21 }
 0x650   : > { %v2367_v23 = vpop.eup %2366 }
 0x651   : > { %v2369_v24 = vpop.eup %2368  ;;  %v1610_v28 = vsel %vm637_vm3, %v2367_v23, 0.0 }
 0x652   : > { %v2371_v29 = vpop.eup %2370  ;;  %v1611_v30 = vsel %vm637_vm3, %v2369_v24, 0.0 }
 0x653   : > { %v2373_v35 = vpop.eup %2372  ;;  %v1612_v36 = vadd.f32 %v1611_v30, %v1610_v28  ;;  %v1613_v37 = vsel %vm637_vm3, %v2371_v29, 0.0 }
 0x654   : > { %v2375_v38 = vpop.eup %2374  ;;  %v1615_v40 = vsel %vm637_vm3, %v2373_v35, 0.0 }
 0x655   : > { %v1614_v39 = vadd.f32 %v1613_v37, %v1612_v36  ;;  %v2377_v41 = vpop.eup %2376  ;;  %v1617_v56 = vsel %vm637_vm3, %v2375_v38, 0.0 }
 0x656   : > { %v2379_v43 = vpop.eup %2378  ;;  %v1619_v45 = vsel %vm637_vm3, %v2377_v41, 0.0 }
 0x657   : > { %v1616_v26 = vadd.f32 %v1615_v40, %v1614_v39  ;;  %v2381_v46 = vpop.eup %2380  ;;  %v1621_v48 = vsel %vm637_vm3, %v2379_v43, 0.0 }
 0x658   : > { %v1623_v50 = vsel %vm637_vm3, %v2381_v46, 0.0 }
 0x659   : > { %v1618_v44 = vadd.f32 %v1617_v56, %v1616_v26 }
 0x65b   : > { %v1620_v47 = vadd.f32 %v1619_v45, %v1618_v44 }
 0x65d   : > { %v1622_v49 = vadd.f32 %v1621_v48, %v1620_v47 }
 0x65f   : > { %v1624_v52 = vadd.f32 %v1623_v50, %v1622_v49 }
 0x661   : > { %v1625_v53 = vrot.slane %v1624_v52, 4 }
 0x663   : > { %v1626_v54 = vadd.f32 %v1625_v53, %v1624_v52 }
 0x665   : > { %v1627_v7 = vrot.slane %v1626_v54, 2 }
 0x667   : > { %v1628_v32 = vadd.f32 %v1627_v7, %v1626_v54 }
 0x669   : > { %v1629_v8 = vrot.slane %v1628_v32, 1 }
 0x66b   : > { %v1630_v63 = vadd.f32 %v1629_v8, %v1628_v32 }
 0x66d   : > { %2382 = vrcp.f32 %v1630_v63 }
 0x677   : > { %v2383_v0 = vpop.eup %2382 }
 0x678   : > { %v1632_v2 = vmul.f32 %v2383_v0, %v2367_v23  ;;  %v1633_v3 = vmul.f32 %v2383_v0, %v2369_v24  ;;  %v1634_v27 = vmul.f32 %v2383_v0, %v2371_v29  ;;  %v1635_v22 = vmul.f32 %v2383_v0, %v2373_v35 }
 0x679   : > { %v1636_v34 = vmul.f32 %v2383_v0, %v2375_v38  ;;  %v1637_v58 = vmul.f32 %v2383_v0, %v2377_v41  ;;  %v1638_v59 = vmul.f32 %v2383_v0, %v2379_v43  ;;  %v1639_v61 = vmul.f32 %v2383_v0, %v2381_v46 }
 0x67a   : > { %v2275_v62 = vpack.c.bf16 %v1633_v3, %v1632_v2  ;;  %v2278_v1 = vpack.c.bf16 %v1635_v22, %v1634_v27 }
 0x67b   : > { %v2281_v4 = vpack.c.bf16 %v1637_v58, %v1636_v34  ;;  %v2284_v5 = vpack.c.bf16 %v1639_v61, %v1638_v59 }
 0x67c   : > { %2276 = vmatpush3.bf16.msra.mxu0 %v2275_v62 }
 0x67d   : > { %2277 = vmatprep.subr.bf16.mxu0 %v2393_v57 }
 0x680   : > { %2279 = vmatpush3.bf16.msra.mxu0 %v2278_v1 }
 0x681   : > { %2280 = vmatprep.subr.bf16.mxu0 %v2393_v57 }
 0x684   : > { %2282 = vmatpush3.bf16.msra.mxu0 %v2281_v4 }
 0x685   : > { %2283 = vmatprep.subr.bf16.mxu0 %v2393_v57 }
 0x688   : > { %2285 = vmatpush3.bf16.msra.mxu0 %v2284_v5 }
 0x689   : > { %2287 = vmatprep.subr.bf16.mxu0 %v2698_v51 }
 0x68b   : > { %2214 = vmatmul.mubr.msk.f32.vlgmr.msra.gmra.mrb[22].mxu0 %vm637_vm3, %v472_v9 }
 0x68c   : > { %2289 = vmatpush3.bf16.msra.mxu0 %v2698_v51  ;;  %2224 = vmatprep.mubr.msk.f32.mxu0 %vm313_vm0, %v1713_v60  ;;  %v1714_v51 = vld [vmem:[%s2789_s3 + $0x8] sm:$0xff] }
 0x75e   : > { %v1709_v55 = vpop.f32.mrb[22].mxu0 }
 0x75f   : > { %v2290_v57 = vpack.c.bf16 %v1709_v55, %v2732_v42  ;;  %v2215_v25 = vpop.f32.mrb[23].mxu0  ;;  %v1734_v42 = vpop.permute.xlu1 %1733 }
 0x761   : > { %2291 = vmatprep.subr.bf16.mxu0 %v2290_v57  ;;  %2295 = vmatprep.subr.bf16.mxu1 %v2290_v57 }
 0x762   : > { %2293 = vmatpush3.bf16.msra.mxu0 %v2290_v57  ;;  %2297 = vmatpush3.bf16.msra.mxu1 %v2290_v57 }
 0x763   : > { %v1739_v12 = vpop.permute.xlu1 %1738 }
 0x765   : > { %2225 = vmatmul.mubr.msk.f32.vlgmr.msra.gmra.mrb[24].mxu0 %vm313_vm0, %v1714_v51  ;;  %2228 = vmatmul.mubr.msk.f32.vlgmr.msra.gmra.mrb[28].mxu1 %vm313_vm0, %v1716_v10 }
 0x838   : > { %v2226_v13 = vpop.f32.mrb[24].mxu0  ;;  %v2229_v14 = vpop.f32.mrb[28].mxu1 }
 0x839   : > { %v1825_v16 = vadd.f32 %v2226_v13, %v1729_v11  ;;  %v1835_v17 = vadd.f32 %v2229_v14, %v1739_v12  ;;  %v1819_v18 = vpop.f32.mrb[25].mxu0  ;;  %v1829_v19 = vpop.f32.mrb[29].mxu1 }
 0x83a   : > { %v1820_v20 = vadd.f32 %v1819_v18, %v1724_v33  ;;  %v1830_v31 = vadd.f32 %v1829_v19, %v1734_v42 }
 0x83b   : > { %1839 = vst.msk [vmem:[%s224_s23 + $0x8] sm:$0xff] %vm637_vm3, %v1825_v16  ;;  %1841 = vst.msk [vmem:[%s224_s23 + $0x18] sm:$0xff] %vm637_vm3, %v1835_v17 }
 0x83c   : > { %1838 = vst.msk [vmem:[%s224_s23] sm:$0xff] %vm637_vm3, %v1820_v20  ;;  %1840 = vst.msk [vmem:[%s224_s23 + $0x10] sm:$0xff] %vm637_vm3, %v1830_v31 }
 0x83d PF: > { %s15_s18 = sadd.s32 1, %s2390_s18  }
 0x83e   : > { %p12_p4 = scmp.ge.s32.totalorder %s15_s18, 4  }
 0x840   :  { %14 = sbr.rel (!%p12_p4) target bundleno = 1 (0x1), region = 70 }

</bundles_post_ra>
